<compile_context>
chip_gen: v6e
topology: v6e:2x2x1
jax: 0.10.0
libtpu: 0.0.40
codegen_flags: <defaults>
</compile_context>

<pallas_src>
import functools

import jax
import jax.numpy as jnp
from jax import lax
from jax.experimental import pallas as pl
from jax.experimental.pallas import tpu as pltpu


def _hash_bits_u32(idx_u32, seed_u32):
    """lowbias32-style stateless hash: uint32 index -> uint32 pseudo-random bits."""
    h = idx_u32 + seed_u32 * jnp.uint32(0x9E3779B9)
    h = h ^ (h >> 16)
    h = h * jnp.uint32(0x7FEB352D)
    h = h ^ (h >> 15)
    h = h * jnp.uint32(0x846CA68B)
    h = h ^ (h >> 16)
    return h


def _residual_kernel(seed_ref, x_ref, y_ref, gb_ref, o_ref,
                     *, dropout_p: float, normalising: bool, eps: float):
    y = y_ref[...].astype(jnp.float32)
    rows, cols = y.shape

    if dropout_p >= 1.0:
        # Everything is dropped; 1/(1-p) scale would be inf, so short-circuit.
        y = jnp.zeros_like(y)
    elif dropout_p > 0.0:
        # Global element index -> tiling-invariant, portable dropout mask.
        row_ids = lax.broadcasted_iota(jnp.int32, (rows, cols), 0).astype(jnp.uint32)
        col_ids = lax.broadcasted_iota(jnp.int32, (rows, cols), 1).astype(jnp.uint32)
        base_row = (pl.program_id(0) * rows).astype(jnp.uint32)
        idx = (base_row + row_ids) * jnp.uint32(cols) + col_ids
        bits = _hash_bits_u32(idx, seed_ref[0].astype(jnp.uint32))
        thr = min(max(int(round(dropout_p * 4294967296.0)), 0), 4294967295)
        keep = bits >= jnp.uint32(thr)  # drop with probability ~p
        y = jnp.where(keep, y * (1.0 / (1.0 - dropout_p)), 0.0)

    z = x_ref[...].astype(jnp.float32) + y

    if normalising:
        gb = gb_ref[...].astype(jnp.float32)
        gamma = gb[0:1, :]
        beta = gb[1:2, :]
        # Single-pass moments: var = E[z^2] - E[z]^2.
        mean = jnp.mean(z, axis=-1, keepdims=True)
        msq = jnp.mean(z * z, axis=-1, keepdims=True)
        var = msq - mean * mean
        inv = lax.rsqrt(var + eps)
        z = (z - mean) * inv * gamma + beta

    o_ref[...] = z.astype(o_ref.dtype)


def residual_forward(x, sublayer_out, gamma, beta, *, dropout_p: float,
                     normalising: bool, seed: int = 0, eps: float = 1e-5,
                     block_rows: int | None = None):
    """Fused dropout + residual add (+ LayerNorm over the feature dim)."""
    orig_shape = x.shape
    D = orig_shape[-1]
    x2 = x.reshape(-1, D)
    y2 = sublayer_out.reshape(-1, D).astype(x.dtype)
    N = x2.shape[0]

    itemsize = jnp.dtype(x.dtype).itemsize

    if block_rows is None:
        # ~2 MiB per input stream: large enough to amortize per-grid-step
        # overhead and hit HBM roofline, small enough that 2 inputs + 1 output,
        # double-buffered, fit comfortably in v7x's 64 MiB VMEM.
        target_bytes = 2 << 20
        mult = 16  # multiple of 16 covers bf16 sublane packing (8 is enough for f32)
        br = max(mult, (target_bytes // max(D * itemsize, 1)) // mult * mult)
        block_rows = int(min(br, ((N + mult - 1) // mult) * mult))

    # Pad rows up to a multiple of block_rows (no-op when already divisible).
    pad = (-N) % block_rows
    if pad:
        x2 = jnp.pad(x2, ((0, pad), (0, 0)))
        y2 = jnp.pad(y2, ((0, pad), (0, 0)))
    Np = N + pad
    grid = (Np // block_rows,)

    # gamma/beta as one (2, D) array: one DMA stream instead of two.
    gb = jnp.concatenate(
        [gamma.reshape(1, D), beta.reshape(1, D)], axis=0).astype(jnp.float32)
    seed_arr = jnp.array([seed], dtype=jnp.int32)

    kernel = functools.partial(
        _residual_kernel,
        dropout_p=float(dropout_p),
        normalising=bool(normalising),
        eps=float(eps),
    )

    # VMEM budget: 2 inputs + 1 output, double-buffered, plus gamma/beta + slack.
    block_bytes = block_rows * D * itemsize
    vmem_limit = int(1.5 * (3 * 2 * block_bytes)) + (2 << 20)
    vmem_limit = max(min(vmem_limit, 64 << 20), 4 << 20)

    out = pl.pallas_call(
        kernel,
        out_shape=jax.ShapeDtypeStruct((Np, D), x.dtype),
        grid_spec=pltpu.PrefetchScalarGridSpec(
            num_scalar_prefetch=1,
            grid=grid,
            in_specs=[
                pl.BlockSpec((block_rows, D), lambda i, seed: (i, 0)),  # x
                pl.BlockSpec((block_rows, D), lambda i, seed: (i, 0)),  # sublayer(x)
                pl.BlockSpec((2, D), lambda i, seed: (0, 0)),           # [gamma; beta]
            ],
            out_specs=pl.BlockSpec((block_rows, D), lambda i, seed: (i, 0)),
        ),
        compiler_params=pltpu.CompilerParams(
            dimension_semantics=("parallel",),
            vmem_limit_bytes=vmem_limit,
        ),
    )(seed_arr, x2, y2, gb)

    return out[:N].reshape(orig_shape)


def _reference(x, y, gamma, beta, *, normalising, eps=1e-5):
    z = x.astype(jnp.float32) + y.astype(jnp.float32)
    if normalising:
        mean = z.mean(-1, keepdims=True)
        var = ((z - mean) ** 2).mean(-1, keepdims=True)
        z = (z - mean) / jnp.sqrt(var + eps) * gamma + beta
    return z.astype(x.dtype)


if __name__ == "__main__":
    # Small shapes consistent with the module: dim_features is the trailing dim.
    B, S, D = 2, 8, 128
    dropout_p = 0.1

    key = jax.random.PRNGKey(0)
    kx, kw, kb = jax.random.split(key, 3)

    x = jax.random.normal(kx, (B, S, D), dtype=jnp.float32)

    # Deterministic "sublayer": a simple linear layer evaluated in plain JAX (glue).
    # TODO(synk): if the sublayer is known to be a Linear, its matmul could be
    # fused into this kernel as a K-reduction axis to avoid the HBM round-trip.
    w = jax.random.normal(kw, (D, D), dtype=jnp.float32) * (1.0 / jnp.sqrt(D))
    bias = jax.random.normal(kb, (D,), dtype=jnp.float32) * 0.01
    sublayer_out = jnp.einsum("bsd,de->bse", x, w) + bias

    # LayerNorm parameters, PyTorch default init: weight = 1, bias = 0.
    gamma = jnp.ones((D,), dtype=jnp.float32)
    beta = jnp.zeros((D,), dtype=jnp.float32)

    # Correctness check (dropout disabled -> deterministic reference).
    out_nd = residual_forward(x, sublayer_out, gamma, beta,
                              dropout_p=0.0, normalising=True, seed=0)
    ref_nd = _reference(x, sublayer_out, gamma, beta, normalising=True)
    jax.block_until_ready(out_nd)
    assert jnp.allclose(out_nd, ref_nd, atol=1e-4, rtol=1e-4)

    out_nd2 = residual_forward(x, sublayer_out, gamma, beta,
                               dropout_p=0.0, normalising=False, seed=0)
    ref_nd2 = _reference(x, sublayer_out, gamma, beta, normalising=False)
    jax.block_until_ready(out_nd2)
    assert jnp.allclose(out_nd2, ref_nd2, atol=1e-5, rtol=1e-5)

    # Training-mode calls with dropout active (both pre-norm and plain residual).
    out = residual_forward(x, sublayer_out, gamma, beta,
                           dropout_p=dropout_p, normalising=True, seed=0)
    out_res = residual_forward(x, sublayer_out, gamma, beta,
                               dropout_p=dropout_p, normalising=False, seed=0)
    jax.block_until_ready((out, out_res))

    assert out.shape == (B, S, D) and out.dtype == x.dtype
    assert out_res.shape == (B, S, D) and out_res.dtype == x.dtype
    print("KERNEL_OK")
</pallas_src>

<mosaic_0001>
module attributes {stable_mosaic.version = 11 : i64} {
  func.func @_residual_kernel(%arg0: i32, %arg1: memref<1xi32, #tpu.memory_space<smem>>, %arg2: memref<16x128xf32, #tpu.memory_space<vmem>>, %arg3: memref<16x128xf32, #tpu.memory_space<vmem>>, %arg4: memref<2x128xf32, #tpu.memory_space<vmem>>, %arg5: memref<16x128xf32, #tpu.memory_space<vmem>>) attributes {dimension_semantics = [#tpu.dimension_semantics<parallel>], iteration_bounds = array<i64: 1>, scalar_prefetch = 1 : i64, scratch_operands = 0 : i64, tpu.core_type = #tpu.core_type<tc>, window_params = [{transform_indices = @transform_0, window_bounds = array<i64: 16, 128>}, {transform_indices = @transform_1, window_bounds = array<i64: 16, 128>}, {pipeline_mode = #tpu.pipeline_mode<synchronous>, transform_indices = @transform_2, window_bounds = array<i64: 2, 128>}, {transform_indices = @transform_3, window_bounds = array<i64: 16, 128>}]} {
    %c0 = arith.constant 0 : index
    %c0_0 = arith.constant 0 : index
    %0 = vector.load %arg3[%c0, %c0_0] : memref<16x128xf32, #tpu.memory_space<vmem>>, vector<16x128xf32>
    %c0_1 = arith.constant 0 : index
    %c0_2 = arith.constant 0 : index
    %1 = vector.load %arg2[%c0_1, %c0_2] : memref<16x128xf32, #tpu.memory_space<vmem>>, vector<16x128xf32>
    %2 = arith.addf %1, %0 : vector<16x128xf32>
    %c0_3 = arith.constant 0 : index
    %c0_4 = arith.constant 0 : index
    %3 = vector.load %arg4[%c0_3, %c0_4] : memref<2x128xf32, #tpu.memory_space<vmem>>, vector<2x128xf32>
    %4 = vector.extract_strided_slice %3 {offsets = [0, 0], sizes = [1, 128], strides = [1, 1]} : vector<2x128xf32> to vector<1x128xf32>
    %5 = vector.extract_strided_slice %3 {offsets = [1, 0], sizes = [1, 128], strides = [1, 1]} : vector<2x128xf32> to vector<1x128xf32>
    %cst = arith.constant dense<0.000000e+00> : vector<16xf32>
    %6 = vector.multi_reduction <add>, %2, %cst [1] : vector<16x128xf32> to vector<16xf32>
    %7 = vector.shape_cast %6 : vector<16xf32> to vector<16x1xf32>
    %cst_5 = arith.constant 1.280000e+02 : f32
    %8 = vector.broadcast %cst_5 : f32 to vector<16x1xf32>
    %9 = arith.divf %7, %8 : vector<16x1xf32>
    %10 = arith.mulf %2, %2 : vector<16x128xf32>
    %cst_6 = arith.constant dense<0.000000e+00> : vector<16xf32>
    %11 = vector.multi_reduction <add>, %10, %cst_6 [1] : vector<16x128xf32> to vector<16xf32>
    %12 = vector.shape_cast %11 : vector<16xf32> to vector<16x1xf32>
    %cst_7 = arith.constant 1.280000e+02 : f32
    %13 = vector.broadcast %cst_7 : f32 to vector<16x1xf32>
    %14 = arith.divf %12, %13 : vector<16x1xf32>
    %15 = arith.mulf %9, %9 : vector<16x1xf32>
    %16 = arith.subf %14, %15 : vector<16x1xf32>
    %cst_8 = arith.constant 9.99999974E-6 : f32
    %17 = vector.broadcast %cst_8 : f32 to vector<16x1xf32>
    %18 = arith.addf %16, %17 : vector<16x1xf32>
    %19 = math.rsqrt %18 : vector<16x1xf32>
    %20 = vector.broadcast %9 : vector<16x1xf32> to vector<16x128xf32>
    %21 = arith.subf %2, %20 : vector<16x128xf32>
    %22 = vector.broadcast %19 : vector<16x1xf32> to vector<16x128xf32>
    %23 = arith.mulf %21, %22 : vector<16x128xf32>
    %24 = vector.broadcast %4 : vector<1x128xf32> to vector<16x128xf32>
    %25 = arith.mulf %23, %24 : vector<16x128xf32>
    %26 = vector.broadcast %5 : vector<1x128xf32> to vector<16x128xf32>
    %27 = arith.addf %25, %26 : vector<16x128xf32>
    %c0_9 = arith.constant 0 : index
    %c0_10 = arith.constant 0 : index
    %28 = vector.load %arg5[%c0_9, %c0_10] : memref<16x128xf32, #tpu.memory_space<vmem>>, vector<16x128xf32>
    tpu.vector_store %arg5[%c0_9, %c0_10], %27 {strides = array<i32>} : memref<16x128xf32, #tpu.memory_space<vmem>>, vector<16x128xf32>,
    return
  }
  func.func @transform_0(%arg0: i32, %arg1: memref<1xi32, #tpu.memory_space<smem>>) -> (i32, i32) {
    %c0_i32 = arith.constant 0 : i32
    %c0_i32_0 = arith.constant 0 : i32
    return %arg0, %c0_i32 : i32, i32
  }
  func.func @transform_1(%arg0: i32, %arg1: memref<1xi32, #tpu.memory_space<smem>>) -> (i32, i32) {
    %c0_i32 = arith.constant 0 : i32
    %c0_i32_0 = arith.constant 0 : i32
    return %arg0, %c0_i32 : i32, i32
  }
  func.func @transform_2(%arg0: i32, %arg1: memref<1xi32, #tpu.memory_space<smem>>) -> (i32, i32) {
    %c0_i32 = arith.constant 0 : i32
    %c0_i32_0 = arith.constant 0 : i32
    %c0_i32_1 = arith.constant 0 : i32
    return %c0_i32, %c0_i32_0 : i32, i32
  }
  func.func @transform_3(%arg0: i32, %arg1: memref<1xi32, #tpu.memory_space<smem>>) -> (i32, i32) {
    %c0_i32 = arith.constant 0 : i32
    %c0_i32_0 = arith.constant 0 : i32
    return %arg0, %c0_i32 : i32, i32
  }
}

</mosaic_0001>

<bundles_post_ra>
// kernel: tpu_custom_call.1
= control target key start
LH: loop header
LB: loop body
LE: loop exit
PB: predicated region body
PF: predicated region fallthrough
CT: control target
= control target key end

     0   :  { %10 = vsyncpa [#allocation5], 0  ;;  %s237_s0 = inlined_call_operand.<no memory space> [shape: s32[1], index: 0, kind: input, shape index: {}]   ;;  %s238_s1 = inlined_call_operand.hbm [shape: f32[16,128], index: 1, kind: input, shape index: {}]   ;;  %s239_s2 = inlined_call_operand.hbm [shape: f32[16,128], index: 2, kind: input, shape index: {}]   ;;  %s240_s3 = inlined_call_operand.vmem [shape: f32[2,128], index: 3, kind: input, shape index: {}]   ;;  %s241_s4 = inlined_call_operand.hbm [shape: f32[16,128], index: 4, kind: output, shape index: {}]  }
   0x1   :  { %11 = vsyncpa [#allocation8], 0 }
   0x2   :  { %12 = vsyncpa [#allocation6], 0  ;;  %s186_s15 = smov [#allocation4]  }
   0x3   :  { %s18_s16 = sshll.u32 %s186_s15, 4  ;;  %s19_s16 = int_to_ptr.vmem [resolvable:$true] %s18_s16 }
   0x4   :  { %s128_s17 = scalar_lea.vmem %s19_s16, 256  ;;  %p133_p1 = scmp.lt.s32.totalorder %s19_s16, %s19_s16 }
   0x5   :  { %p129_p0 = scmp.ne.s32.totalorder %s19_s16, %s128_s17  ;;  %p134_p2 = scmp.lt.s32.totalorder %s128_s17, %s128_s17 }
   0x7   :  { %p135_p3 = por %p134_p2, %p133_p1 }
   0x9   :  { %p136_p4 = pnand %p135_p3, %p129_p0 }
   0xb   :  { %139 = shalt.err (!%p136_p4)
}
   0xc   :  { %s187_s0 = smov 128   ;;  %s188_s18 = smov 8  }
   0xd   :  { %24 = dma.hbm_to_vmem [thread:$0]  %s238_s1, 256, %s19_s16, [#allocation5], %s187_s0, %s187_s0, %s188_s18  }
   0xe   :  { %s189_s21 = smov [#allocation7]  }
   0xf   :  { %s30_s22 = sshll.u32 %s189_s21, 4  ;;  %s31_s22 = int_to_ptr.vmem [resolvable:$true] %s30_s22 }
  0x10   :  { %s148_s23 = scalar_lea.vmem %s31_s22, 256  ;;  %p153_p6 = scmp.lt.s32.totalorder %s31_s22, %s31_s22 }
  0x11   :  { %p149_p5 = scmp.ne.s32.totalorder %s31_s22, %s148_s23  ;;  %p154_p7 = scmp.lt.s32.totalorder %s148_s23, %s148_s23 }
  0x13   :  { %p155_p8 = por %p154_p7, %p153_p6 }
  0x15   :  { %p156_p9 = pnand %p155_p8, %p149_p5 }
  0x17   :  { %159 = shalt.err (!%p156_p9)
}
  0x18   :  { %36 = dma.hbm_to_vmem [thread:$0]  %s239_s2, 256, %s31_s22, [#allocation8], %s187_s0, %s187_s0, %s188_s18  }
  0x19   :  { %180 = dma.done.wait [#allocation5], 256  }
  0x1a   :  { %181 = vsyncadd [#allocation5], 4294967040 }
  0x1b   :  { %182 = dma.done.wait [#allocation8], 256  }
  0x1c   :  { %183 = vsyncadd [#allocation8], 4294967040  ;;  %v45_v0 = vld [vmem:[#allocation7] sm:$0xff]  ;;  %v47_v1 = vld [vmem:[#allocation4] sm:$0xff]  ;;  %v79_v21 = vlaneseq  ;;  %s190_s26 = smov [#allocation9]  }
  0x1d   :  { %v46_v2 = vld [vmem:[#allocation7 + $0x8] sm:$0xff]  ;;  %v49_v3 = vadd.f32 %v47_v1, %v45_v0  ;;  %v48_v4 = vld [vmem:[#allocation4 + $0x8] sm:$0xff]  ;;  %v51_v25 = vld [vmem:[%s240_s3] sm:$0x3]  ;;  %s98_s27 = sshll.u32 %s190_s26, 4  ;;  %s99_s27 = int_to_ptr.vmem [resolvable:$true] %s98_s27 }
  0x1e   :  { %v50_v5 = vadd.f32 %v48_v4, %v46_v2  ;;  %v80_v23 = vshrl.u32 %v79_v21, 7  ;;  %s160_s28 = scalar_lea.vmem %s99_s27, 256  ;;  %p165_p11 = scmp.lt.s32.totalorder %s99_s27, %s99_s27 }
  0x1f   :  { %52 = vadd.xlane.f32.xlu0 %v49_v3  ;;  %v59_v6 = vmul.f32 %v49_v3, %v49_v3  ;;  %p161_p10 = scmp.ne.s32.totalorder %s99_s27, %s160_s28  ;;  %p166_p12 = scmp.lt.s32.totalorder %s160_s28, %s160_s28 }
  0x20   :  { %v60_v7 = vmul.f32 %v50_v5, %v50_v5  ;;  %v81_v24 = vsub.s32 0, %v80_v23  ;;  %v87_v26 = vsub.s32 1, %v80_v23 }
  0x21   :  { %61 = vadd.xlane.f32.xlu1 %v59_v6  ;;  %p167_p13 = por %p166_p12, %p165_p11 }
  0x22   :  { %v82_v28 = vrot.slane %v51_v25, %v81_v24  ;;  %v88_v31 = vrot.slane %v51_v25, %v87_v26 }
  0x23   :  { %54 = vadd.xlane.f32.xlu0 %v50_v5  ;;  %p168_p0 = pnand %p167_p13, %p161_p10 }
  0x25   :  { %63 = vadd.xlane.f32.xlu1 %v60_v7 }
  0xa8   :  { %v53_v8 = vpop.xlane.xlu0 %52 }
  0xa9   :  { %v57_v9 = vmul.f32 0.0078125, %v53_v8 }
  0xaa   :  { %v62_v10 = vpop.xlane.xlu1 %61 }
  0xab   :  { %v67_v11 = vmul.f32 %v57_v9, %v57_v9  ;;  %v65_v12 = vmul.f32 0.0078125, %v62_v10  ;;  %v75_v27 = vsub.f32 %v49_v3, %v57_v9 }
  0xac   :  { %v55_v13 = vpop.xlane.xlu0 %54 }
  0xad   :  { %v69_v14 = vsub.f32 %v65_v12, %v67_v11  ;;  %v58_v15 = vmul.f32 0.0078125, %v55_v13 }
  0xae   :  { %v64_v16 = vpop.xlane.xlu1 %63 }
  0xaf   :  { %v71_v17 = vadd.f32 1e-05, %v69_v14  ;;  %v68_v18 = vmul.f32 %v58_v15, %v58_v15  ;;  %v66_v19 = vmul.f32 0.0078125, %v64_v16  ;;  %v76_v32 = vsub.f32 %v50_v5, %v58_v15 }
  0xb1   :  { %116 = vrsqrt.f32 %v71_v17  ;;  %v70_v20 = vsub.f32 %v66_v19, %v68_v18 }
  0xb3   :  { %v72_v22 = vadd.f32 1e-05, %v70_v20 }
  0xb5   :  { %118 = vrsqrt.f32 %v72_v22 }
  0xbe   :  { %v117_v29 = vpop.eup %116 }
  0xbf   :  { %v77_v30 = vmul.f32 %v117_v29, %v75_v27 }
  0xc1   :  { %v83_v33 = vmul.f32 %v82_v28, %v77_v30 }
  0xc2   :  { %v119_v34 = vpop.eup %118 }
  0xc3   :  { %v78_v35 = vmul.f32 %v119_v34, %v76_v32  ;;  %v89_v36 = vadd.f32 %v88_v31, %v83_v33 }
  0xc5   :  { %v84_v37 = vmul.f32 %v82_v28, %v78_v35  ;;  %91 = vst [vmem:[#allocation9] sm:$0xff] %v89_v36 }
  0xc7   :  { %v90_v38 = vadd.f32 %v88_v31, %v84_v37 }
  0xc9   :  { %92 = vst [vmem:[#allocation9 + $0x8] sm:$0xff] %v90_v38 }
  0xca   :  { %171 = shalt.err (!%p168_p0)
}
  0xcb   :  { %104 = dma.vmem_to_hbm [thread:$0]  %s99_s27, 256, %s241_s4, [#allocation6], %s187_s0, %s187_s0, %s188_s18  }
  0xcc   :  { %184 = dma.done.wait [#allocation6], 256  }
  0xcd   :  { %185 = vsyncadd [#allocation6], 4294967040 }
  0xce   :  { %108 = vsyncpa [#allocation5], 1 }
  0xcf   :  { %109 = vsyncpa [#allocation8], 1 }
  0xd0   :  { %110 = vsyncpa [#allocation6], 1 }

</bundles_post_ra>
